<compile_context>
chip_gen: v6e
topology: v6e:2x2x1
jax: 0.10.0
libtpu: 0.0.40
codegen_flags: <defaults>
</compile_context>

<pallas_src>
import jax
import jax.numpy as jnp
from jax.experimental import pallas as pl
from jax.experimental.pallas import tpu as pltpu


def dqn_kernel(x_ref, m1_ref, b1_ref, m2_ref, b2_ref, o_ref):
    # x_ref:  [TR, 128]   -- 32 samples per row (4 states each), lane-dense
    # m1_ref: [128, 288]  = kron(I_32, W1^T)      b1_ref: [1, 288] = tile(b1, 32)
    # m2_ref: [288, 96]   = kron(I_32, W2^T)      b2_ref: [1, 96]  = tile(b2, 32)
    # o_ref:  [TR, 96]    -- 32 samples per row (3 Q-values each), lane-dense
    x = x_ref[...]
    h = jnp.dot(x, m1_ref[...], preferred_element_type=jnp.float32) + b1_ref[...]
    # LeakyReLU, PyTorch default negative_slope = 0.01
    h = jnp.where(h > 0, h, jnp.float32(0.01) * h)
    y = jnp.dot(h, m2_ref[...], preferred_element_type=jnp.float32) + b2_ref[...]
    # sigmoid(y) = 0.5*tanh(0.5*y) + 0.5 : one EUP op, stable for all y.
    o_ref[...] = (0.5 * jnp.tanh(0.5 * y) + 0.5).astype(o_ref.dtype)


def dqn_forward(x, w1, b1, w2, b2, *, tile_b=65536):
    """x: [B, S] f32; w1: [H, S]; b1: [H]; w2: [A, H]; b2: [A]  ->  [B, A] f32."""
    B, S = x.shape
    H = w1.shape[0]
    A = w2.shape[0]
    assert 128 % S == 0, "state_size must divide the 128-lane vreg width"
    G = 128 // S                      # samples packed per lane-dense row (32 for S=4)

    # Pad batch to a multiple of G.  Zero-copy for aligned batches (the common
    # replay-buffer minibatch case); only ragged batches pay one small pad copy.
    Bp = pl.cdiv(B, G) * G
    x_p = x if Bp == B else jnp.pad(x, ((0, Bp - B), (0, 0)))
    R = Bp // G
    x2 = x_p.reshape(R, G * S)        # free contiguous reshape: [B,4] -> [B/32,128]

    # Block-diagonal replicated weights (built once per call; ~0.25 MiB total,
    # resident in VMEM across all grid steps).
    eye = jnp.eye(G, dtype=jnp.float32)
    m1 = jnp.kron(eye, w1.T.astype(jnp.float32))             # [G*S, G*H] = [128, 288]
    m2 = jnp.kron(eye, w2.T.astype(jnp.float32))             # [G*H, G*A] = [288, 96]
    b1r = jnp.tile(b1.astype(jnp.float32), G).reshape(1, G * H)
    b2r = jnp.tile(b2.astype(jnp.float32), G).reshape(1, G * A)

    # Row tile: big enough to amortize per-step overhead, but >=2 grid steps
    # when possible so the "parallel" batch axis shards across both v7x TCs.
    tr = max(1, min(tile_b // G, pl.cdiv(R, 2)))
    if tr >= R:
        tr = R                        # single block covering the whole array
    elif tr % 8 != 0:
        tr = max(8, (tr // 8) * 8)    # sublane dim must be a multiple of 8
        if tr >= R:
            tr = R
    grid = (pl.cdiv(R, tr),)          # ragged last block handled by Pallas

    out2 = pl.pallas_call(
        dqn_kernel,
        out_shape=jax.ShapeDtypeStruct((R, G * A), jnp.float32),
        grid_spec=pltpu.PrefetchScalarGridSpec(
            num_scalar_prefetch=0,
            grid=grid,
            in_specs=[
                pl.BlockSpec((tr, G * S), lambda i: (i, 0)),     # streamed batch tile
                pl.BlockSpec((G * S, G * H), lambda i: (0, 0)),  # weights stay resident
                pl.BlockSpec((1, G * H), lambda i: (0, 0)),
                pl.BlockSpec((G * H, G * A), lambda i: (0, 0)),
                pl.BlockSpec((1, G * A), lambda i: (0, 0)),
            ],
            out_specs=pl.BlockSpec((tr, G * A), lambda i: (i, 0)),
        ),
        compiler_params=pltpu.CompilerParams(
            dimension_semantics=("parallel",),   # v7x: shard batch across 2 TCs
        ),
        cost_estimate=pl.CostEstimate(
            flops=2 * R * ((G * S) * (G * H) + (G * H) * (G * A)),
            transcendentals=Bp * A,              # one tanh per Q-value
            bytes_accessed=4 * (Bp * S + Bp * A
                                + (G * S) * (G * H) + (G * H) * (G * A)
                                + G * H + G * A),
        ),
    )(x2, m1, b1r, m2, b2r)

    out = out2.reshape(Bp, A)         # free contiguous reshape: [B/32,96] -> [B,3]
    return out if Bp == B else out[:B]


def init_params(key, state_size=4, hidden=9, action_size=3):
    """nn.Linear-style U(-1/sqrt(fan_in), 1/sqrt(fan_in)), PyTorch [out,in] layout."""
    k1, k2, k3, k4 = jax.random.split(key, 4)
    bound1 = 1.0 / jnp.sqrt(jnp.float32(state_size))
    bound2 = 1.0 / jnp.sqrt(jnp.float32(hidden))
    w1 = jax.random.uniform(k1, (hidden, state_size), jnp.float32, -bound1, bound1)
    b1 = jax.random.uniform(k2, (hidden,), jnp.float32, -bound1, bound1)
    w2 = jax.random.uniform(k3, (action_size, hidden), jnp.float32, -bound2, bound2)
    b2 = jax.random.uniform(k4, (action_size,), jnp.float32, -bound2, bound2)
    return w1, b1, w2, b2


def reference_forward(x, w1, b1, w2, b2):
    h = x @ w1.T + b1
    h = jnp.where(h > 0, h, 0.01 * h)
    y = h @ w2.T + b2
    return jax.nn.sigmoid(y)


if __name__ == "__main__":
    key = jax.random.PRNGKey(0)
    k_x, k_p = jax.random.split(key)

    state_size, hidden, action_size = 4, 9, 3
    w1, b1, w2, b2 = init_params(k_p, state_size, hidden, action_size)

    # 1) Small shape matching the module: batch of 2 states of size 4
    #    (exercises the ragged-batch pad path + single-block grid).
    batch = 2
    x = jax.random.normal(k_x, (batch, state_size), jnp.float32)
    out = jax.block_until_ready(dqn_forward(x, w1, b1, w2, b2))
    ref = reference_forward(x, w1, b1, w2, b2)
    assert out.shape == (batch, action_size)
    assert jnp.allclose(out, ref, atol=1e-4, rtol=1e-4), "mismatch vs reference"

    # 2) Unaligned batch with a small tile to force a multi-step grid and a
    #    ragged last block (B=300 -> pad to 320 -> 10 rows, 2 grid steps).
    batch2 = 300
    x2 = jax.random.normal(k_x, (batch2, state_size), jnp.float32)
    out2 = jax.block_until_ready(dqn_forward(x2, w1, b1, w2, b2, tile_b=256))
    ref2 = reference_forward(x2, w1, b1, w2, b2)
    assert out2.shape == (batch2, action_size)
    assert jnp.allclose(out2, ref2, atol=1e-4, rtol=1e-4), "mismatch (ragged/tiled)"

    # 3) Aligned batch: zero-copy reshape path, multi-step grid, default tiling.
    batch3 = 1024
    x3 = jax.random.normal(k_x, (batch3, state_size), jnp.float32)
    out3 = jax.block_until_ready(dqn_forward(x3, w1, b1, w2, b2))
    ref3 = reference_forward(x3, w1, b1, w2, b2)
    assert out3.shape == (batch3, action_size)
    assert jnp.allclose(out3, ref3, atol=1e-4, rtol=1e-4), "mismatch (aligned)"

    print("KERNEL_OK")
</pallas_src>

<mosaic_0001>
module attributes {stable_mosaic.version = 11 : i64} {
  func.func @dqn_kernel(%arg0: i32, %arg1: memref<1x128xf32, #tpu.memory_space<vmem>>, %arg2: memref<128x288xf32, #tpu.memory_space<vmem>>, %arg3: memref<1x288xf32, #tpu.memory_space<vmem>>, %arg4: memref<288x96xf32, #tpu.memory_space<vmem>>, %arg5: memref<1x96xf32, #tpu.memory_space<vmem>>, %arg6: memref<1x96xf32, #tpu.memory_space<vmem>>) attributes {dimension_semantics = [#tpu.dimension_semantics<parallel>], iteration_bounds = array<i64: 1>, scalar_prefetch = 0 : i64, scratch_operands = 0 : i64, tpu.core_type = #tpu.core_type<tc>, window_params = [{transform_indices = @transform_0, window_bounds = array<i64: 1, 128>}, {pipeline_mode = #tpu.pipeline_mode<synchronous>, transform_indices = @transform_1, window_bounds = array<i64: 128, 288>}, {pipeline_mode = #tpu.pipeline_mode<synchronous>, transform_indices = @transform_2, window_bounds = array<i64: 1, 288>}, {pipeline_mode = #tpu.pipeline_mode<synchronous>, transform_indices = @transform_3, window_bounds = array<i64: 288, 96>}, {pipeline_mode = #tpu.pipeline_mode<synchronous>, transform_indices = @transform_4, window_bounds = array<i64: 1, 96>}, {transform_indices = @transform_5, window_bounds = array<i64: 1, 96>}]} {
    %c0 = arith.constant 0 : index
    %c0_0 = arith.constant 0 : index
    %0 = vector.load %arg1[%c0, %c0_0] : memref<1x128xf32, #tpu.memory_space<vmem>>, vector<1x128xf32>
    %c0_1 = arith.constant 0 : index
    %c0_2 = arith.constant 0 : index
    %1 = vector.load %arg2[%c0_1, %c0_2] : memref<128x288xf32, #tpu.memory_space<vmem>>, vector<128x288xf32>
    %cst = arith.constant dense<0.000000e+00> : vector<1x288xf32>
    %2 = tpu.matmul %0, %1, %cst {dimension_numbers = #tpu.dot_dimension_numbers<[1], [0], [0], [1], [0, 0, 1, 1], [], []>} : vector<1x128xf32>, vector<128x288xf32>, vector<1x288xf32> -> vector<1x288xf32>
    %c0_3 = arith.constant 0 : index
    %c0_4 = arith.constant 0 : index
    %3 = vector.load %arg3[%c0_3, %c0_4] : memref<1x288xf32, #tpu.memory_space<vmem>>, vector<1x288xf32>
    %4 = arith.addf %2, %3 : vector<1x288xf32>
    %cst_5 = arith.constant 0.000000e+00 : f32
    %5 = vector.broadcast %cst_5 : f32 to vector<1x288xf32>
    %6 = arith.cmpf ogt, %4, %5 : vector<1x288xf32>
    %cst_6 = arith.constant 0.00999999977 : f32
    %7 = vector.broadcast %cst_6 : f32 to vector<1x288xf32>
    %8 = arith.mulf %7, %4 : vector<1x288xf32>
    %9 = arith.select %6, %4, %8 : vector<1x288xi1>, vector<1x288xf32>
    %c0_7 = arith.constant 0 : index
    %c0_8 = arith.constant 0 : index
    %10 = vector.load %arg4[%c0_7, %c0_8] : memref<288x96xf32, #tpu.memory_space<vmem>>, vector<288x96xf32>
    %cst_9 = arith.constant dense<0.000000e+00> : vector<1x96xf32>
    %11 = tpu.matmul %9, %10, %cst_9 {dimension_numbers = #tpu.dot_dimension_numbers<[1], [0], [0], [1], [0, 0, 1, 1], [], []>} : vector<1x288xf32>, vector<288x96xf32>, vector<1x96xf32> -> vector<1x96xf32>
    %c0_10 = arith.constant 0 : index
    %c0_11 = arith.constant 0 : index
    %12 = vector.load %arg5[%c0_10, %c0_11] : memref<1x96xf32, #tpu.memory_space<vmem>>, vector<1x96xf32>
    %13 = arith.addf %11, %12 : vector<1x96xf32>
    %cst_12 = arith.constant 5.000000e-01 : f32
    %14 = vector.broadcast %cst_12 : f32 to vector<1x96xf32>
    %15 = arith.mulf %14, %13 : vector<1x96xf32>
    %16 = math.tanh %15 : vector<1x96xf32>
    %cst_13 = arith.constant 5.000000e-01 : f32
    %17 = vector.broadcast %cst_13 : f32 to vector<1x96xf32>
    %18 = arith.mulf %17, %16 : vector<1x96xf32>
    %cst_14 = arith.constant 5.000000e-01 : f32
    %19 = vector.broadcast %cst_14 : f32 to vector<1x96xf32>
    %20 = arith.addf %18, %19 : vector<1x96xf32>
    %c0_15 = arith.constant 0 : index
    %c0_16 = arith.constant 0 : index
    %21 = vector.load %arg6[%c0_15, %c0_16] : memref<1x96xf32, #tpu.memory_space<vmem>>, vector<1x96xf32>
    tpu.vector_store %arg6[%c0_15, %c0_16], %20 {strides = array<i32>} : memref<1x96xf32, #tpu.memory_space<vmem>>, vector<1x96xf32>,
    return
  }
  func.func @transform_0(%arg0: i32) -> (i32, i32) {
    %c0_i32 = arith.constant 0 : i32
    %c0_i32_0 = arith.constant 0 : i32
    return %arg0, %c0_i32 : i32, i32
  }
  func.func @transform_1(%arg0: i32) -> (i32, i32) {
    %c0_i32 = arith.constant 0 : i32
    %c0_i32_0 = arith.constant 0 : i32
    %c0_i32_1 = arith.constant 0 : i32
    return %c0_i32, %c0_i32_0 : i32, i32
  }
  func.func @transform_2(%arg0: i32) -> (i32, i32) {
    %c0_i32 = arith.constant 0 : i32
    %c0_i32_0 = arith.constant 0 : i32
    %c0_i32_1 = arith.constant 0 : i32
    return %c0_i32, %c0_i32_0 : i32, i32
  }
  func.func @transform_3(%arg0: i32) -> (i32, i32) {
    %c0_i32 = arith.constant 0 : i32
    %c0_i32_0 = arith.constant 0 : i32
    %c0_i32_1 = arith.constant 0 : i32
    return %c0_i32, %c0_i32_0 : i32, i32
  }
  func.func @transform_4(%arg0: i32) -> (i32, i32) {
    %c0_i32 = arith.constant 0 : i32
    %c0_i32_0 = arith.constant 0 : i32
    %c0_i32_1 = arith.constant 0 : i32
    return %c0_i32, %c0_i32_0 : i32, i32
  }
  func.func @transform_5(%arg0: i32) -> (i32, i32) {
    %c0_i32 = arith.constant 0 : i32
    %c0_i32_0 = arith.constant 0 : i32
    return %arg0, %c0_i32 : i32, i32
  }
}

</mosaic_0001>

<bundles_post_ra>
// kernel: tpu_custom_call.1
= control target key start
LH: loop header
LB: loop body
LE: loop exit
PB: predicated region body
PF: predicated region fallthrough
CT: control target
= control target key end

     0   :  { %v569_v4 = vmov 0.0   ;;  %s889_s0 = inlined_call_operand.vmem [shape: f32[1,128], index: 0, kind: input, shape index: {}]   ;;  %s890_s1 = inlined_call_operand.vmem [shape: f32[128,288], index: 1, kind: input, shape index: {}]   ;;  %s891_s2 = inlined_call_operand.vmem [shape: f32[1,288], index: 2, kind: input, shape index: {}]   ;;  %s892_s3 = inlined_call_operand.vmem [shape: f32[288,96], index: 3, kind: input, shape index: {}]   ;;  %s893_s4 = inlined_call_operand.vmem [shape: f32[1,96], index: 4, kind: input, shape index: {}]   ;;  %s894_s5 = inlined_call_operand.hbm [shape: f32[1,96], index: 5, kind: output, shape index: {}]  }
   0x1   :  { %v68_v0 = vld [vmem:[%s890_s1 + $0x170] sm:$0xff]  ;;  %v67_v1 = vld [vmem:[%s890_s1 + $0x168] sm:$0xff]  ;;  %v65_v2 = vld [vmem:[%s890_s1 + $0x158] sm:$0xff]  ;;  %496 = vmatprep.subr.mxu1 %v569_v4  ;;  %151 = vmatprep.mubr.f32.mxu0 %v569_v4 }
   0x2   :  { %87 = vmatprep.subr.mxu0 %v68_v0  ;;  %v64_v3 = vld [vmem:[%s890_s1 + $0x150] sm:$0xff]  ;;  %v62_v5 = vld [vmem:[%s890_s1 + $0x140] sm:$0xff]  ;;  %v69_v6 = vld [vmem:[%s890_s1 + $0x178] sm:$0xff] }
   0x3   :  { %88 = vmatpush1.msra.mxu0 %v67_v1  ;;  %v61_v7 = vld [vmem:[%s890_s1 + $0x138] sm:$0xff]  ;;  %497 = vmatpush3.msra.mxu1 %v69_v6  ;;  %v66_v8 = vld [vmem:[%s890_s1 + $0x160] sm:$0xff]  ;;  %v59_v9 = vld [vmem:[%s890_s1 + $0x128] sm:$0xff] }
   0x4   :  { %89 = vmatprep.subr.mxu0 %v65_v2  ;;  %498 = vmatprep.subr.mxu1 %v569_v4  ;;  %v63_v10 = vld [vmem:[%s890_s1 + $0x148] sm:$0xff]  ;;  %v58_v11 = vld [vmem:[%s890_s1 + $0x120] sm:$0xff]  ;;  %v56_v12 = vld [vmem:[%s890_s1 + $0x110] sm:$0xff] }
   0x5   :  { %90 = vmatpush1.msra.mxu0 %v64_v3  ;;  %499 = vmatpush3.msra.mxu1 %v66_v8  ;;  %v60_v13 = vld [vmem:[%s890_s1 + $0x130] sm:$0xff]  ;;  %v55_v14 = vld [vmem:[%s890_s1 + $0x108] sm:$0xff]  ;;  %v53_v15 = vld [vmem:[%s890_s1 + $0xf8] sm:$0xff] }
   0x6   :  { %91 = vmatprep.subr.mxu0 %v62_v5  ;;  %500 = vmatprep.subr.mxu1 %v569_v4  ;;  %v57_v16 = vld [vmem:[%s890_s1 + $0x118] sm:$0xff]  ;;  %v52_v17 = vld [vmem:[%s890_s1 + $0xf0] sm:$0xff]  ;;  %v50_v18 = vld [vmem:[%s890_s1 + $0xe0] sm:$0xff] }
   0x7   :  { %92 = vmatpush1.msra.mxu0 %v61_v7  ;;  %501 = vmatpush3.msra.mxu1 %v63_v10  ;;  %v54_v19 = vld [vmem:[%s890_s1 + $0x100] sm:$0xff]  ;;  %v49_v20 = vld [vmem:[%s890_s1 + $0xd8] sm:$0xff]  ;;  %v47_v21 = vld [vmem:[%s890_s1 + $0xc8] sm:$0xff] }
   0x8   :  { %93 = vmatprep.subr.mxu0 %v59_v9  ;;  %502 = vmatprep.subr.mxu1 %v569_v4  ;;  %v51_v22 = vld [vmem:[%s890_s1 + $0xe8] sm:$0xff]  ;;  %v46_v23 = vld [vmem:[%s890_s1 + $0xc0] sm:$0xff]  ;;  %v44_v24 = vld [vmem:[%s890_s1 + $0xb0] sm:$0xff] }
   0x9   :  { %94 = vmatpush1.msra.mxu0 %v58_v11  ;;  %503 = vmatpush3.msra.mxu1 %v60_v13  ;;  %v48_v25 = vld [vmem:[%s890_s1 + $0xd0] sm:$0xff]  ;;  %v43_v26 = vld [vmem:[%s890_s1 + $0xa8] sm:$0xff]  ;;  %v41_v27 = vld [vmem:[%s890_s1 + $0x98] sm:$0xff] }
   0xa   :  { %95 = vmatprep.subr.mxu0 %v56_v12  ;;  %504 = vmatprep.subr.mxu1 %v569_v4  ;;  %v45_v28 = vld [vmem:[%s890_s1 + $0xb8] sm:$0xff]  ;;  %v40_v29 = vld [vmem:[%s890_s1 + $0x90] sm:$0xff]  ;;  %v38_v30 = vld [vmem:[%s890_s1 + $0x80] sm:$0xff] }
   0xb   :  { %96 = vmatpush1.msra.mxu0 %v55_v14  ;;  %505 = vmatpush3.msra.mxu1 %v57_v16  ;;  %v42_v31 = vld [vmem:[%s890_s1 + $0xa0] sm:$0xff]  ;;  %v37_v32 = vld [vmem:[%s890_s1 + $0x78] sm:$0xff]  ;;  %v35_v33 = vld [vmem:[%s890_s1 + $0x68] sm:$0xff] }
   0xc   :  { %97 = vmatprep.subr.mxu0 %v53_v15  ;;  %506 = vmatprep.subr.mxu1 %v569_v4  ;;  %v39_v34 = vld [vmem:[%s890_s1 + $0x88] sm:$0xff]  ;;  %v34_v35 = vld [vmem:[%s890_s1 + $0x60] sm:$0xff]  ;;  %v32_v36 = vld [vmem:[%s890_s1 + $0x50] sm:$0xff] }
   0xd   :  { %98 = vmatpush1.msra.mxu0 %v52_v17  ;;  %507 = vmatpush3.msra.mxu1 %v54_v19  ;;  %v36_v37 = vld [vmem:[%s890_s1 + $0x70] sm:$0xff]  ;;  %v31_v38 = vld [vmem:[%s890_s1 + $0x48] sm:$0xff]  ;;  %v29_v39 = vld [vmem:[%s890_s1 + $0x38] sm:$0xff] }
   0xe   :  { %99 = vmatprep.subr.mxu0 %v50_v18  ;;  %508 = vmatprep.subr.mxu1 %v569_v4  ;;  %v33_v40 = vld [vmem:[%s890_s1 + $0x58] sm:$0xff] }
   0xf   :  { %100 = vmatpush1.msra.mxu0 %v49_v20  ;;  %509 = vmatpush3.msra.mxu1 %v51_v22 }
  0x10   :  { %101 = vmatprep.subr.mxu0 %v47_v21  ;;  %510 = vmatprep.subr.mxu1 %v569_v4 }
  0x11   :  { %102 = vmatpush1.msra.mxu0 %v46_v23  ;;  %511 = vmatpush3.msra.mxu1 %v48_v25 }
  0x12   :  { %103 = vmatprep.subr.mxu0 %v44_v24  ;;  %512 = vmatprep.subr.mxu1 %v569_v4 }
  0x13   :  { %104 = vmatpush1.msra.mxu0 %v43_v26  ;;  %513 = vmatpush3.msra.mxu1 %v45_v28 }
  0x14   :  { %105 = vmatprep.subr.mxu0 %v41_v27  ;;  %514 = vmatprep.subr.mxu1 %v569_v4 }
  0x15   :  { %106 = vmatpush1.msra.mxu0 %v40_v29  ;;  %515 = vmatpush3.msra.mxu1 %v42_v31 }
  0x16   :  { %107 = vmatprep.subr.mxu0 %v38_v30  ;;  %516 = vmatprep.subr.mxu1 %v569_v4 }
  0x17   :  { %108 = vmatpush1.msra.mxu0 %v37_v32  ;;  %517 = vmatpush3.msra.mxu1 %v39_v34 }
  0x18   :  { %109 = vmatprep.subr.mxu0 %v35_v33  ;;  %518 = vmatprep.subr.mxu1 %v569_v4 }
  0x19   :  { %110 = vmatpush1.msra.mxu0 %v34_v35 }
  0x1a   :  { %10 = vsyncpa [#allocation3], 0  ;;  %111 = vmatprep.subr.mxu0 %v32_v36  ;;  %v28_v41 = vld [vmem:[%s890_s1 + $0x30] sm:$0xff]  ;;  %519 = vmatpush3.msra.mxu1 %v36_v37  ;;  %v26_v42 = vld [vmem:[%s890_s1 + $0x20] sm:$0xff]  ;;  %vm570_vm0 = vmmov 0   ;;  %v72_v23 = vlaneseq  ;;  %vm274_vm2 = vcmask 261120  }
  0x1b   :  { %112 = vmatpush1.msra.mxu0 %v31_v38  ;;  %520 = vmatprep.subr.mxu1 %v569_v4  ;;  %v30_v43 = vld [vmem:[%s890_s1 + $0x40] sm:$0xff]  ;;  %v25_v44 = vld [vmem:[%s890_s1 + $0x18] sm:$0xff]  ;;  %v23_v45 = vld [vmem:[%s890_s1 + $0x8] sm:$0xff]  ;;  %s571_s9 = smov [#allocation2]   ;;  %vm422_vm5 = vcmask 778240  }
  0x1c   :  { %113 = vmatprep.subr.mxu0 %v29_v39  ;;  %521 = vmatpush3.msra.mxu1 %v33_v40  ;;  %v27_v46 = vld [vmem:[%s890_s1 + $0x28] sm:$0xff]  ;;  %v22_v47 = vld [vmem:[%s890_s1] sm:$0xff]  ;;  %v24_v49 = vld [vmem:[%s890_s1 + $0x10] sm:$0xff]  ;;  %v73_v24 = vshrl.u32 %v72_v23, 7  ;;  %s430_s10 = sshll.u32 %s571_s9, 4  ;;  %s431_s10 = int_to_ptr.vmem [resolvable:$true] %s430_s10 }
  0x1d   :  { %114 = vmatpush1.msra.mxu0 %v28_v41  ;;  %522 = vmatprep.subr.mxu1 %v569_v4  ;;  %v21_v48 = vld [vmem:[%s889_s0] sm:$0x1]  ;;  %v268_v50 = vld [vmem:[%s892_s3 + $0xf8] sm:$0xff]  ;;  %v267_v52 = vld [vmem:[%s892_s3 + $0xf0] sm:$0xff]  ;;  %s547_s11 = scalar_lea.vmem %s431_s10, 16  ;;  %s551_s12 = scalar_lea.vmem %s431_s10, 32 }
  0x1e   :  { %115 = vmatprep.subr.mxu0 %v26_v42  ;;  %523 = vmatpush3.msra.mxu1 %v30_v43  ;;  %v252_v51 = vld [vmem:[%s892_s3 + $0x78] sm:$0xff]  ;;  %v251_v53 = vld [vmem:[%s892_s3 + $0x70] sm:$0xff]  ;;  %v266_v54 = vld [vmem:[%s892_s3 + $0xe8] sm:$0xff]  ;;  %v74_v25 = vsub.s32 0, %v73_v24  ;;  %v78_v27 = vsub.s32 1, %v73_v24  ;;  %v82_v28 = vsub.s32 2, %v73_v24  ;;  %p548_p0 = scmp.ne.s32.totalorder %s431_s10, %s547_s11  ;;  %p552_p1 = scmp.lt.s32.totalorder %s431_s10, %s431_s10 }
  0x1f   :  { %116 = vmatpush1.msra.mxu0 %v25_v44  ;;  %524 = vmatprep.subr.mxu1 %v569_v4  ;;  %v250_v55 = vld [vmem:[%s892_s3 + $0x68] sm:$0xff]  ;;  %v265_v56 = vld [vmem:[%s892_s3 + $0xe0] sm:$0xff]  ;;  %v264_v58 = vld [vmem:[%s892_s3 + $0xd8] sm:$0xff]  ;;  %p553_p2 = scmp.lt.s32.totalorder %s551_s12, %s547_s11 }
  0x20   :  { %117 = vmatprep.subr.mxu0 %v23_v45  ;;  %525 = vmatpush3.msra.mxu1 %v27_v46  ;;  %v249_v57 = vld [vmem:[%s892_s3 + $0x60] sm:$0xff]  ;;  %v248_v59 = vld [vmem:[%s892_s3 + $0x58] sm:$0xff]  ;;  %v263_v60 = vld [vmem:[%s892_s3 + $0xd0] sm:$0xff] }
  0x21   :  { %118 = vmatpush1.msra.mxu0 %v22_v47  ;;  %526 = vmatprep.subr.mxu1 %v569_v4  ;;  %v247_v61 = vld [vmem:[%s892_s3 + $0x50] sm:$0xff]  ;;  %v262_v62 = vld [vmem:[%s892_s3 + $0xc8] sm:$0xff]  ;;  %v261_v0 = vld [vmem:[%s892_s3 + $0xc0] sm:$0xff]  ;;  %p554_p3 = por %p553_p2, %p552_p1 }
  0x22   :  { %152 = vmatmul.mubr.f32.vlgmr.msra.gmra.mxu0 %v21_v48  ;;  %527 = vmatpush3.msra.mxu1 %v24_v49  ;;  %v246_v63 = vld [vmem:[%s892_s3 + $0x48] sm:$0xff]  ;;  %v245_v1 = vld [vmem:[%s892_s3 + $0x40] sm:$0xff]  ;;  %v260_v2 = vld [vmem:[%s892_s3 + $0xb8] sm:$0xff] }
  0x23   :  { %528 = vmatprep.mubr.msk.f32.mxu1 %vm570_vm0, %v569_v4  ;;  %456 = vmatprep.subr.mxu0 %v268_v50  ;;  %v244_v3 = vld [vmem:[%s892_s3 + $0x38] sm:$0xff]  ;;  %v259_v5 = vld [vmem:[%s892_s3 + $0xb0] sm:$0xff]  ;;  %v258_v7 = vld [vmem:[%s892_s3 + $0xa8] sm:$0xff]  ;;  %p555_p4 = pnand %p554_p3, %p548_p0 }
  0x24   :  { %529 = vmatmul.mubr.f32.vlgmr.msra.gmra.mxu1 %v21_v48  ;;  %457 = vmatpush3.msra.mxu0 %v252_v51  ;;  %v243_v6 = vld [vmem:[%s892_s3 + $0x30] sm:$0xff]  ;;  %v242_v8 = vld [vmem:[%s892_s3 + $0x28] sm:$0xff]  ;;  %v257_v9 = vld [vmem:[%s892_s3 + $0xa0] sm:$0xff] }
  0x25   :  { %458 = vmatprep.subr.mxu0 %v267_v52  ;;  %531 = vmatprep.subr.mxu1 %v569_v4  ;;  %v241_v10 = vld [vmem:[%s892_s3 + $0x20] sm:$0xff]  ;;  %v256_v11 = vld [vmem:[%s892_s3 + $0x98] sm:$0xff]  ;;  %v255_v13 = vld [vmem:[%s892_s3 + $0x90] sm:$0xff] }
  0x26   :  { %459 = vmatpush3.msra.mxu0 %v251_v53  ;;  %539 = vmatprep.mubr.msk.f32.mxu1 %vm570_vm0, %v569_v4  ;;  %v240_v12 = vld [vmem:[%s892_s3 + $0x18] sm:$0xff]  ;;  %v239_v14 = vld [vmem:[%s892_s3 + $0x10] sm:$0xff]  ;;  %v254_v16 = vld [vmem:[%s892_s3 + $0x88] sm:$0xff] }
  0x27   :  { %460 = vmatprep.subr.mxu0 %v266_v54  ;;  %v272_v15 = vld [vmem:[%s892_s3 + $0x118] sm:$0xff]  ;;  %v238_v17 = vld [vmem:[%s892_s3 + $0x8] sm:$0xff]  ;;  %v271_v18 = vld [vmem:[%s892_s3 + $0x110] sm:$0xff] }
  0x28   :  { %461 = vmatpush3.msra.mxu0 %v250_v55  ;;  %532 = vmatpush3.msra.mxu1 %v272_v15  ;;  %v253_v19 = vld [vmem:[%s892_s3 + $0x80] sm:$0xff]  ;;  %v270_v21 = vld [vmem:[%s892_s3 + $0x108] sm:$0xff] }
  0x29   :  { %462 = vmatprep.subr.mxu0 %v265_v56  ;;  %533 = vmatprep.subr.mxu1 %v569_v4  ;;  %v237_v20 = vld [vmem:[%s892_s3] sm:$0xff] }
  0x2a   :  { %463 = vmatpush3.msra.mxu0 %v249_v57  ;;  %534 = vmatpush3.msra.mxu1 %v271_v18  ;;  %v269_v22 = vld [vmem:[%s892_s3 + $0x100] sm:$0xff] }
  0x2b   :  { %464 = vmatprep.subr.mxu0 %v264_v58  ;;  %535 = vmatprep.subr.mxu1 %v569_v4  ;;  %v70_v26 = vld [vmem:[%s891_s2] sm:$0x7] }
  0x2c   :  { %465 = vmatpush3.msra.mxu0 %v248_v59  ;;  %536 = vmatpush3.msra.mxu1 %v270_v21  ;;  %v75_v29 = vrot.slane %v70_v26, %v74_v25  ;;  %v79_v30 = vrot.slane %v70_v26, %v78_v27  ;;  %v83_v31 = vrot.slane %v70_v26, %v82_v28  ;;  %v273_v48 = vld [vmem:[%s893_s4] sm:$0x1] }
  0x2d   :  { %466 = vmatprep.subr.mxu0 %v263_v60  ;;  %537 = vmatprep.subr.mxu1 %v569_v4 }
  0x2e   :  { %467 = vmatpush3.msra.mxu0 %v247_v61  ;;  %538 = vmatpush3.msra.mxu1 %v269_v22 }
  0x2f   :  { %468 = vmatprep.subr.mxu0 %v262_v62 }
  0x30   :  { %469 = vmatpush3.msra.mxu0 %v246_v63 }
  0x31   :  { %470 = vmatprep.subr.mxu0 %v261_v0 }
  0x32   :  { %471 = vmatpush3.msra.mxu0 %v245_v1 }
  0x33   :  { %472 = vmatprep.subr.mxu0 %v260_v2 }
  0x34   :  { %473 = vmatpush3.msra.mxu0 %v244_v3 }
  0x35   :  { %474 = vmatprep.subr.mxu0 %v259_v5 }
  0x36   :  { %475 = vmatpush3.msra.mxu0 %v243_v6 }
  0x37   :  { %476 = vmatprep.subr.mxu0 %v258_v7 }
  0x38   :  { %477 = vmatpush3.msra.mxu0 %v242_v8 }
  0x39   :  { %478 = vmatprep.subr.mxu0 %v257_v9 }
  0x3a   :  { %479 = vmatpush3.msra.mxu0 %v241_v10 }
  0x3b   :  { %480 = vmatprep.subr.mxu0 %v256_v11 }
  0x3c   :  { %481 = vmatpush3.msra.mxu0 %v240_v12 }
  0x3d   :  { %482 = vmatprep.subr.mxu0 %v255_v13 }
  0x3e   :  { %483 = vmatpush3.msra.mxu0 %v239_v14 }
  0x3f   :  { %484 = vmatprep.subr.mxu0 %v254_v16 }
  0x40   :  { %485 = vmatpush3.msra.mxu0 %v238_v17 }
  0x41   :  { %486 = vmatprep.subr.mxu0 %v253_v19 }
  0x42   :  { %487 = vmatpush3.msra.mxu0 %v237_v20 }
  0xe2   :  { %v153_v32 = vpop.f32.mrf.mxu0 }
  0xe3   :  { %v154_v33 = vadd.f32 %v153_v32, %v75_v29 }
  0xe4   :  { %v155_v4 = vpop.f32.mrf.mxu0  ;;  %v224_v34 = vpop.f32.mrf.mxu1 }
  0xe5   :  { %v156_v35 = vadd.f32 %v155_v4, %v79_v30  ;;  %v225_v36 = vadd.f32 %v224_v34, %v83_v31  ;;  %vm228_vm1 = vcmp.gt.f32.partialorder %v154_v33, 0.0  ;;  %v231_v37 = vmul.f32 0.01, %v154_v33 }
  0xe6   :  { %v530_v38 = vpop.f32.mrf.mxu1 }
  0xe7   :  { %v232_v39 = vmul.f32 0.01, %v156_v35  ;;  %vm230_vm3 = vcmp.gt.f32.partialorder %v225_v36, 0.0  ;;  %v233_v40 = vmul.f32 0.01, %v225_v36  ;;  %vm229_vm4 = vcmp.gt.f32.partialorder %v156_v35, 0.0 }
  0xe8   :  { %v234_v43 = vsel %vm228_vm1, %v154_v33, %v231_v37 }
  0xe9   :  { %v236_v41 = vsel %vm230_vm3, %v225_v36, %v233_v40  ;;  %v235_v42 = vsel %vm229_vm4, %v156_v35, %v232_v39 }
  0xea   :  { %342 = vmatprep.mubr.f32.mxu0 %v235_v42  ;;  %540 = vmatmul.mubr.msk.f32.vlgmr.msra.gmra.mxu1 %vm274_vm2, %v236_v41 }
  0xeb   :  { %343 = vmatmul.mubr.f32.vlgmr.msra.gmra.mxu0 %v234_v43 }
 0x1aa   :  { %v414_v44 = vpop.f32.mrf.mxu1 }
 0x1ab   :  { %v488_v45 = vpop.f32.mrf.mxu0 }
 0x1ac   :  { %v541_v46 = vpop.f32.mrf.mxu1 }
 0x1ad   :  { %v489_v47 = vpop.f32.mrf.mxu0 }
 0x1ae   :  { %v490_v49 = vadd.f32 %v489_v47, %v488_v45 }
 0x1b0   :  { %v345_v50 = vadd.f32 %v490_v49, %v273_v48 }
 0x1b2   :  { %v415_v51 = vadd.f32 %v414_v44, %v345_v50 }
 0x1b4   :  { %v418_v52 = vmul.f32 0.5, %v415_v51 }
 0x1b6   :  { %545 = vtanh.f32 %v418_v52 }
 0x1c3   :  { %v546_v53 = vpop.eup %545 }
 0x1c4   :  { %v420_v54 = vmul.f32 0.5, %v546_v53 }
 0x1c6   :  { %v421_v55 = vadd.f32 0.5, %v420_v54 }
 0x1c8   :  { %423 = vst.msk [vmem:[#allocation2] sm:$0x1] %vm422_vm5, %v421_v55 }
 0x1c9   :  { %558 = shalt.err (!%p555_p4)
}
 0x1ca   :  { %433 = dma.vmem_to_hbm [thread:$0]  %s431_s10, 16, %s894_s5, [#allocation3]  }
 0x1cb   :  { %567 = dma.done.wait [#allocation3], 16  }
 0x1cc   :  { %568 = vsyncadd [#allocation3], 4294967280 }
 0x1cd   :  { %437 = vsyncpa [#allocation3], 1 }

</bundles_post_ra>
